<compile_context>
chip_gen: v7x
topology: tpu7x:2x2x1
jax: 0.10.0
libtpu: 0.0.40
codegen_flags: <defaults>
</compile_context>

<pallas_src>
import functools

import jax
import jax.numpy as jnp
from jax import lax
from jax.experimental import pallas as pl
from jax.experimental.pallas import tpu as pltpu

KH = KW = 3                  # kernel_size = 3
PAD = (KH - 1) // 2          # get_same_padding(3) == 1
EPS = 1e-5                   # BatchNorm2d default eps

# bf16 matmul inputs / intermediates (MXU-native on v5e/v6e/v7x, half the DMA
# bytes); accumulation and BN statistics stay f32.
MATMUL_DTYPE = jnp.bfloat16


def _round_up(x, m):
    return (x + m - 1) // m * m


def _pick_tile_h(h, w, max_rows=2048):
    """Largest TILE_H dividing H whose TILE_H*W is lane-dense (multiple of 128
    or the full image) and <= max_rows; falls back to the full image."""
    best = h
    for th in range(1, h + 1):
        if h % th:
            continue
        tm = th * w
        if tm <= max_rows and (tm % 128 == 0 or th == h):
            best = th
    return best


def _pick_divisor(n, cap, align):
    """Largest divisor of n that is <= cap and (aligned or the full extent)."""
    best = None
    for d in range(1, min(n, cap) + 1):
        if n % d == 0 and (d % align == 0 or d == n):
            best = d
    return best if best is not None else n


def conv_stats_kernel(x_ref, w_ref, y_ref, s_ref, *, tile_m, w_img, out_c):
    """One (batch, row-block) tile of the implicit-GEMM conv + partial stats.

    x_ref: (1, 1, (TILE_H+2)*W, K3p)  kw-expanded halo-padded rows (bf16)
    w_ref: (KH, K3p, O_pad)           per-kh weight slabs (bf16, resident)
    y_ref: (1, O, TILE_M)             conv activation, transposed/compact (bf16)
    s_ref: (1, 1, 2, O_pad)           per-tile [sum, centered M2] (f32)
    """
    x = x_ref[0, 0]                                          # (R_in, K3p)
    acc = jnp.dot(x[0:tile_m, :], w_ref[0],
                  preferred_element_type=jnp.float32)        # kh = 0
    acc = acc + jnp.dot(x[w_img:w_img + tile_m, :], w_ref[1],
                        preferred_element_type=jnp.float32)  # kh = 1
    acc = acc + jnp.dot(x[2 * w_img:2 * w_img + tile_m, :], w_ref[2],
                        preferred_element_type=jnp.float32)  # kh = 2

    # Per-tile BN statistics: sum and mean-centered M2 (Chan-combinable).
    tsum = jnp.sum(acc, axis=0, keepdims=True)               # (1, O_pad)
    diff = acc - tsum * (1.0 / tile_m)
    tm2 = jnp.sum(diff * diff, axis=0, keepdims=True)        # (1, O_pad)
    s_ref[0, 0, 0:1, :] = tsum                               # plain vst, no concat
    s_ref[0, 0, 1:2, :] = tm2

    # Store the activation transposed -> compact lane-dense (O, TILE_M) slab
    # (NCHW layout falls out for free; transpose is VMEM-local XLU work).
    y_ref[0, :, :] = acc.T[:out_c, :].astype(y_ref.dtype)


def bn_relu_kernel(y_ref, sc_ref, sh_ref, o_ref):
    """Fused per-channel scale/shift + ReLU on one large lane-dense tile."""
    y = y_ref[...].astype(jnp.float32)                       # (TILE_R, TILE_C)
    o_ref[...] = jnp.maximum(y * sc_ref[...] + sh_ref[...], 0.0)


@jax.jit
def conv_layer_forward(x_nchw, w_oihw, gamma, beta):
    """ConvLayer(in_c, out_c, 3, 1, bias=False, use_bn=True, act='relu').forward
    on an NCHW input, returning NCHW output."""
    N, C, H, W = x_nchw.shape
    O = w_oihw.shape[0]
    HW = H * W
    M = N * HW

    K3 = KW * C                         # contraction per kh (kw-expanded)
    K3p = _round_up(K3, 128)
    O_pad = _round_up(O, 128)

    TILE_H = _pick_tile_h(H, W, max_rows=2048)
    TILE_M = TILE_H * W
    n_hb = H // TILE_H
    R_in = (TILE_H + 2 * PAD) * W       # rows per input stripe (incl. halo)

    # ---- wrapper glue (XLA): NCHW->NHWC bf16, pad, kw-expand, halo blocks ---
    # TODO(synk): when adjacent layers run NHWC, take NHWC directly and drop
    # this transpose (it is one extra HBM read+write of the input).
    x_nhwc = jnp.transpose(x_nchw, (0, 2, 3, 1)).astype(MATMUL_DTYPE)
    xp = jnp.pad(x_nhwc, ((0, 0), (PAD, PAD), (PAD, PAD), (0, 0)))
    xkw = jnp.concatenate([xp[:, :, kw:kw + W, :] for kw in range(KW)],
                          axis=-1)                       # (N, H+2, W, 3C)
    blocks = jnp.stack(
        [xkw[:, hb * TILE_H: hb * TILE_H + TILE_H + 2 * PAD]
         for hb in range(n_hb)], axis=1)                 # (N, n_hb, TILE_H+2, W, 3C)
    xin = blocks.reshape(N, n_hb, R_in, K3)
    xin = jnp.pad(xin, ((0, 0), (0, 0), (0, 0), (0, K3p - K3)))

    # OIHW -> (kh, kw*C, O), matching the kw-expanded tap order.
    wt = jnp.transpose(w_oihw, (2, 3, 1, 0)).astype(jnp.float32)   # (KH,KW,C,O)
    w3 = wt.reshape(KH, KW * C, O)
    w3 = jnp.pad(w3, ((0, 0), (0, K3p - K3), (0, O_pad - O))).astype(MATMUL_DTYPE)

    cparams = pltpu.CompilerParams(
        dimension_semantics=("parallel", "parallel"),
        vmem_limit_bytes=48 * 1024 * 1024)   # safe on v5e/v6e (128 MiB) & v7x (64 MiB)

    conv_cost = pl.CostEstimate(
        flops=2 * M * KH * K3p * O_pad,
        transcendentals=0,
        bytes_accessed=(2 * N * n_hb * R_in * K3p      # bf16 input stripes
                        + 2 * KH * K3p * O_pad         # bf16 weights
                        + 2 * N * O * HW               # bf16 compact activation
                        + 4 * N * n_hb * 2 * O_pad))   # f32 stats

    # ---- pass 1: implicit-GEMM conv + per-tile partial stats ----------------
    conv_out, tile_stats = pl.pallas_call(
        functools.partial(conv_stats_kernel, tile_m=TILE_M, w_img=W, out_c=O),
        grid=(N, n_hb),
        in_specs=[pl.BlockSpec((1, 1, R_in, K3p), lambda n, hb: (n, hb, 0, 0)),
                  pl.BlockSpec((KH, K3p, O_pad), lambda n, hb: (0, 0, 0))],
        out_specs=[pl.BlockSpec((1, O, TILE_M), lambda n, hb: (n, 0, hb)),
                   pl.BlockSpec((1, 1, 2, O_pad), lambda n, hb: (n, hb, 0, 0))],
        out_shape=(jax.ShapeDtypeStruct((N, O, HW), MATMUL_DTYPE),
                   jax.ShapeDtypeStruct((N, n_hb, 2, O_pad), jnp.float32)),
        compiler_params=cparams,
        cost_estimate=conv_cost,
    )(xin, w3)

    # ---- glue: Chan-combine per-tile (sum, M2) -> global scale/shift (f32) --
    cnt = float(TILE_M)                               # every tile is full
    tsum = tile_stats[:, :, 0, :O]                    # (N, n_hb, O)
    tm2 = tile_stats[:, :, 1, :O]
    gsum = jnp.sum(tsum, axis=(0, 1))
    mean = gsum / M
    tmean = tsum / cnt
    m2 = jnp.sum(tm2, axis=(0, 1)) + cnt * jnp.sum((tmean - mean) ** 2, axis=(0, 1))
    var = m2 / M                                      # biased, matches BN training
    inv_std = lax.rsqrt(var + EPS)
    scale = gamma.astype(jnp.float32) * inv_std
    shift = beta.astype(jnp.float32) - mean * scale
    R = N * O
    scale_rows = jnp.tile(scale, (N,)).reshape(R, 1)  # per (n, o) row of pass 2
    shift_rows = jnp.tile(shift, (N,)).reshape(R, 1)
    # TODO(synk): BatchNorm2d running_mean/running_var buffer updates
    # (training-mode side effect) are not emitted; only the forward activation.

    # ---- pass 2: fused scale/shift + ReLU on large lane-dense tiles ---------
    TILE_C = _pick_divisor(HW, 8192, 128)
    TILE_R = _pick_divisor(R, max(8, (4 << 20) // (4 * TILE_C)), 8)

    out_flat = pl.pallas_call(
        bn_relu_kernel,
        grid=(R // TILE_R, HW // TILE_C),
        in_specs=[pl.BlockSpec((TILE_R, TILE_C), lambda i, j: (i, j)),
                  pl.BlockSpec((TILE_R, 1), lambda i, j: (i, 0)),
                  pl.BlockSpec((TILE_R, 1), lambda i, j: (i, 0))],
        out_specs=pl.BlockSpec((TILE_R, TILE_C), lambda i, j: (i, j)),
        out_shape=jax.ShapeDtypeStruct((R, HW), jnp.float32),
        compiler_params=cparams,
    )(conv_out.reshape(R, HW), scale_rows, shift_rows)

    return out_flat.reshape(N, O, H, W)               # NCHW via free reshape


def reference_forward(x_nchw, w_oihw, gamma, beta):
    """Pure-JAX f32 reference (conv + training-mode BN + ReLU)."""
    y = lax.conv_general_dilated(
        x_nchw.astype(jnp.float32), w_oihw.astype(jnp.float32),
        window_strides=(1, 1), padding=((PAD, PAD), (PAD, PAD)),
        dimension_numbers=('NCHW', 'OIHW', 'NCHW'))
    mean = y.mean(axis=(0, 2, 3), keepdims=True)
    var = ((y - mean) ** 2).mean(axis=(0, 2, 3), keepdims=True)
    yn = (y - mean) / jnp.sqrt(var + EPS)
    yn = yn * gamma.reshape(1, -1, 1, 1) + beta.reshape(1, -1, 1, 1)
    return jnp.maximum(yn, 0.0)


if __name__ == "__main__":
    # ConvLayer(in_channels=4, out_channels=8, kernel_size=3, stride=1,
    #           dilation=1, groups=1, bias=False, use_bn=True, act_func='relu')
    N, C, H, W = 2, 4, 16, 16
    O = 8

    key = jax.random.PRNGKey(0)
    kx, kw, kg, kb = jax.random.split(key, 4)
    x = jax.random.normal(kx, (N, C, H, W), dtype=jnp.float32)
    w = jax.random.normal(kw, (O, C, KH, KW), dtype=jnp.float32) * 0.1
    gamma = 1.0 + 0.1 * jax.random.normal(kg, (O,), dtype=jnp.float32)
    beta = 0.1 * jax.random.normal(kb, (O,), dtype=jnp.float32)

    out = conv_layer_forward(x, w, gamma, beta)
    out = jax.block_until_ready(out)

    ref = reference_forward(x, w, gamma, beta)
    assert out.shape == (N, O, H, W), out.shape
    err = float(jnp.max(jnp.abs(out - ref)))
    # bf16 matmul inputs + bf16 compact activation => relaxed tolerance vs f32 ref.
    assert jnp.allclose(out, ref, atol=5e-2, rtol=5e-2), f"max abs err = {err}"

    print("KERNEL_OK")
</pallas_src>

<mosaic_0001>
module attributes {stable_mosaic.version = 11 : i64} {
  func.func @conv_stats_kernel(%arg0: i32, %arg1: i32, %arg2: memref<1x1x288x128xbf16, #tpu.memory_space<vmem>>, %arg3: memref<3x128x128xbf16, #tpu.memory_space<vmem>>, %arg4: memref<1x8x256xbf16, #tpu.memory_space<vmem>>, %arg5: memref<1x1x2x128xf32, #tpu.memory_space<vmem>>) attributes {dimension_semantics = [#tpu.dimension_semantics<parallel>, #tpu.dimension_semantics<parallel>], iteration_bounds = array<i64: 2, 1>, scalar_prefetch = 0 : i64, scratch_operands = 0 : i64, tpu.core_type = #tpu.core_type<tc>, window_params = [{transform_indices = @transform_0, window_bounds = array<i64: 1, 1, 288, 128>}, {pipeline_mode = #tpu.pipeline_mode<synchronous>, transform_indices = @transform_1, window_bounds = array<i64: 3, 128, 128>}, {transform_indices = @transform_2, window_bounds = array<i64: 1, 8, 256>}, {transform_indices = @transform_3, window_bounds = array<i64: 1, 1, 2, 128>}]} {
    %c0 = arith.constant 0 : index
    %c0_0 = arith.constant 0 : index
    %c0_1 = arith.constant 0 : index
    %c0_2 = arith.constant 0 : index
    %0 = vector.load %arg2[%c0, %c0_0, %c0_1, %c0_2] : memref<1x1x288x128xbf16, #tpu.memory_space<vmem>>, vector<1x1x288x128xbf16>
    %1 = vector.shape_cast %0 : vector<1x1x288x128xbf16> to vector<288x128xbf16>
    %2 = vector.extract_strided_slice %1 {offsets = [0, 0], sizes = [256, 128], strides = [1, 1]} : vector<288x128xbf16> to vector<256x128xbf16>
    %c0_3 = arith.constant 0 : index
    %c0_4 = arith.constant 0 : index
    %c0_5 = arith.constant 0 : index
    %3 = vector.load %arg3[%c0_3, %c0_4, %c0_5] : memref<3x128x128xbf16, #tpu.memory_space<vmem>>, vector<1x128x128xbf16>
    %4 = vector.shape_cast %3 : vector<1x128x128xbf16> to vector<128x128xbf16>
    %cst = arith.constant dense<0.000000e+00> : vector<256x128xf32>
    %5 = tpu.matmul %2, %4, %cst {dimension_numbers = #tpu.dot_dimension_numbers<[1], [0], [0], [1], [0, 0, 1, 1], [], []>} : vector<256x128xbf16>, vector<128x128xbf16>, vector<256x128xf32> -> vector<256x128xf32>
    %6 = vector.extract_strided_slice %1 {offsets = [16, 0], sizes = [256, 128], strides = [1, 1]} : vector<288x128xbf16> to vector<256x128xbf16>
    %c1 = arith.constant 1 : index
    %c0_6 = arith.constant 0 : index
    %c0_7 = arith.constant 0 : index
    %7 = vector.load %arg3[%c1, %c0_6, %c0_7] : memref<3x128x128xbf16, #tpu.memory_space<vmem>>, vector<1x128x128xbf16>
    %8 = vector.shape_cast %7 : vector<1x128x128xbf16> to vector<128x128xbf16>
    %cst_8 = arith.constant dense<0.000000e+00> : vector<256x128xf32>
    %9 = tpu.matmul %6, %8, %cst_8 {dimension_numbers = #tpu.dot_dimension_numbers<[1], [0], [0], [1], [0, 0, 1, 1], [], []>} : vector<256x128xbf16>, vector<128x128xbf16>, vector<256x128xf32> -> vector<256x128xf32>
    %10 = arith.addf %5, %9 : vector<256x128xf32>
    %11 = vector.extract_strided_slice %1 {offsets = [32, 0], sizes = [256, 128], strides = [1, 1]} : vector<288x128xbf16> to vector<256x128xbf16>
    %c2 = arith.constant 2 : index
    %c0_9 = arith.constant 0 : index
    %c0_10 = arith.constant 0 : index
    %12 = vector.load %arg3[%c2, %c0_9, %c0_10] : memref<3x128x128xbf16, #tpu.memory_space<vmem>>, vector<1x128x128xbf16>
    %13 = vector.shape_cast %12 : vector<1x128x128xbf16> to vector<128x128xbf16>
    %cst_11 = arith.constant dense<0.000000e+00> : vector<256x128xf32>
    %14 = tpu.matmul %11, %13, %cst_11 {dimension_numbers = #tpu.dot_dimension_numbers<[1], [0], [0], [1], [0, 0, 1, 1], [], []>} : vector<256x128xbf16>, vector<128x128xbf16>, vector<256x128xf32> -> vector<256x128xf32>
    %15 = arith.addf %10, %14 : vector<256x128xf32>
    %cst_12 = arith.constant dense<0.000000e+00> : vector<128xf32>
    %16 = vector.multi_reduction <add>, %15, %cst_12 [0] : vector<256x128xf32> to vector<128xf32>
    %17 = vector.shape_cast %16 : vector<128xf32> to vector<1x128xf32>
    %cst_13 = arith.constant 3.906250e-03 : f32
    %18 = vector.broadcast %cst_13 : f32 to vector<1x128xf32>
    %19 = arith.mulf %17, %18 : vector<1x128xf32>
    %20 = vector.broadcast %19 : vector<1x128xf32> to vector<256x128xf32>
    %21 = arith.subf %15, %20 : vector<256x128xf32>
    %22 = arith.mulf %21, %21 : vector<256x128xf32>
    %cst_14 = arith.constant dense<0.000000e+00> : vector<128xf32>
    %23 = vector.multi_reduction <add>, %22, %cst_14 [0] : vector<256x128xf32> to vector<128xf32>
    %24 = vector.shape_cast %23 : vector<128xf32> to vector<1x128xf32>
    %c0_15 = arith.constant 0 : index
    %c0_16 = arith.constant 0 : index
    %c0_17 = arith.constant 0 : index
    %c0_18 = arith.constant 0 : index
    %25 = vector.load %arg5[%c0_15, %c0_16, %c0_17, %c0_18] : memref<1x1x2x128xf32, #tpu.memory_space<vmem>>, vector<1x1x1x128xf32>
    %26 = vector.shape_cast %25 : vector<1x1x1x128xf32> to vector<1x128xf32>
    %27 = vector.shape_cast %17 : vector<1x128xf32> to vector<1x1x1x128xf32>
    tpu.vector_store %arg5[%c0_15, %c0_16, %c0_17, %c0_18], %27 {strides = array<i32>} : memref<1x1x2x128xf32, #tpu.memory_space<vmem>>, vector<1x1x1x128xf32>,
    %c0_19 = arith.constant 0 : index
    %c0_20 = arith.constant 0 : index
    %c1_21 = arith.constant 1 : index
    %c0_22 = arith.constant 0 : index
    %28 = vector.load %arg5[%c0_19, %c0_20, %c1_21, %c0_22] : memref<1x1x2x128xf32, #tpu.memory_space<vmem>>, vector<1x1x1x128xf32>
    %29 = vector.shape_cast %28 : vector<1x1x1x128xf32> to vector<1x128xf32>
    %30 = vector.shape_cast %24 : vector<1x128xf32> to vector<1x1x1x128xf32>
    tpu.vector_store %arg5[%c0_19, %c0_20, %c1_21, %c0_22], %30 {strides = array<i32>} : memref<1x1x2x128xf32, #tpu.memory_space<vmem>>, vector<1x1x1x128xf32>,
    %31 = tpu.transpose %15, [1, 0] : vector<256x128xf32> -> vector<128x256xf32>
    %32 = vector.extract_strided_slice %31 {offsets = [0, 0], sizes = [8, 256], strides = [1, 1]} : vector<128x256xf32> to vector<8x256xf32>
    %33 = arith.truncf %32 : vector<8x256xf32> to vector<8x256xbf16>
    %c0_23 = arith.constant 0 : index
    %c0_24 = arith.constant 0 : index
    %c0_25 = arith.constant 0 : index
    %34 = vector.load %arg4[%c0_23, %c0_24, %c0_25] : memref<1x8x256xbf16, #tpu.memory_space<vmem>>, vector<1x8x256xbf16>
    %35 = vector.shape_cast %34 : vector<1x8x256xbf16> to vector<8x256xbf16>
    %36 = vector.shape_cast %33 : vector<8x256xbf16> to vector<1x8x256xbf16>
    tpu.vector_store %arg4[%c0_23, %c0_24, %c0_25], %36 {strides = array<i32>} : memref<1x8x256xbf16, #tpu.memory_space<vmem>>, vector<1x8x256xbf16>,
    return
  }
  func.func @transform_0(%arg0: i32, %arg1: i32) -> (i32, i32, i32, i32) {
    %c0_i32 = arith.constant 0 : i32
    %c0_i32_0 = arith.constant 0 : i32
    %c0_i32_1 = arith.constant 0 : i32
    return %arg0, %arg1, %c0_i32, %c0_i32_0 : i32, i32, i32, i32
  }
  func.func @transform_1(%arg0: i32, %arg1: i32) -> (i32, i32, i32) {
    %c0_i32 = arith.constant 0 : i32
    %c0_i32_0 = arith.constant 0 : i32
    %c0_i32_1 = arith.constant 0 : i32
    %c0_i32_2 = arith.constant 0 : i32
    return %c0_i32, %c0_i32_0, %c0_i32_1 : i32, i32, i32
  }
  func.func @transform_2(%arg0: i32, %arg1: i32) -> (i32, i32, i32) {
    %c0_i32 = arith.constant 0 : i32
    %c0_i32_0 = arith.constant 0 : i32
    return %arg0, %c0_i32, %arg1 : i32, i32, i32
  }
  func.func @transform_3(%arg0: i32, %arg1: i32) -> (i32, i32, i32, i32) {
    %c0_i32 = arith.constant 0 : i32
    %c0_i32_0 = arith.constant 0 : i32
    %c0_i32_1 = arith.constant 0 : i32
    return %arg0, %arg1, %c0_i32, %c0_i32_0 : i32, i32, i32, i32
  }
}

module attributes {stable_mosaic.version = 11 : i64} {
  func.func @bn_relu_kernel(%arg0: i32, %arg1: i32, %arg2: memref<16x256xbf16, #tpu.memory_space<vmem>>, %arg3: memref<16x1xf32, #tpu.memory_space<vmem>>, %arg4: memref<16x1xf32, #tpu.memory_space<vmem>>, %arg5: memref<16x256xf32, #tpu.memory_space<vmem>>) attributes {dimension_semantics = [#tpu.dimension_semantics<parallel>, #tpu.dimension_semantics<parallel>], iteration_bounds = array<i64: 1, 1>, scalar_prefetch = 0 : i64, scratch_operands = 0 : i64, tpu.core_type = #tpu.core_type<tc>, window_params = [{transform_indices = @transform_0, window_bounds = array<i64: 16, 256>}, {transform_indices = @transform_1, window_bounds = array<i64: 16, 1>}, {transform_indices = @transform_2, window_bounds = array<i64: 16, 1>}, {transform_indices = @transform_3, window_bounds = array<i64: 16, 256>}]} {
    %c0 = arith.constant 0 : index
    %c0_0 = arith.constant 0 : index
    %0 = vector.load %arg2[%c0, %c0_0] : memref<16x256xbf16, #tpu.memory_space<vmem>>, vector<16x256xbf16>
    %1 = arith.extf %0 : vector<16x256xbf16> to vector<16x256xf32>
    %c0_1 = arith.constant 0 : index
    %c0_2 = arith.constant 0 : index
    %2 = vector.load %arg3[%c0_1, %c0_2] : memref<16x1xf32, #tpu.memory_space<vmem>>, vector<16x1xf32>
    %3 = vector.broadcast %2 : vector<16x1xf32> to vector<16x256xf32>
    %4 = arith.mulf %1, %3 : vector<16x256xf32>
    %c0_3 = arith.constant 0 : index
    %c0_4 = arith.constant 0 : index
    %5 = vector.load %arg4[%c0_3, %c0_4] : memref<16x1xf32, #tpu.memory_space<vmem>>, vector<16x1xf32>
    %6 = vector.broadcast %5 : vector<16x1xf32> to vector<16x256xf32>
    %7 = arith.addf %4, %6 : vector<16x256xf32>
    %cst = arith.constant 0.000000e+00 : f32
    %8 = vector.broadcast %cst : f32 to vector<16x256xf32>
    %9 = arith.maximumf %7, %8 : vector<16x256xf32>
    %c0_5 = arith.constant 0 : index
    %c0_6 = arith.constant 0 : index
    %10 = vector.load %arg5[%c0_5, %c0_6] : memref<16x256xf32, #tpu.memory_space<vmem>>, vector<16x256xf32>
    tpu.vector_store %arg5[%c0_5, %c0_6], %9 {strides = array<i32>} : memref<16x256xf32, #tpu.memory_space<vmem>>, vector<16x256xf32>,
    return
  }
  func.func @transform_0(%arg0: i32, %arg1: i32) -> (i32, i32) {
    %c0_i32 = arith.constant 0 : i32
    return %arg0, %arg1 : i32, i32
  }
  func.func @transform_1(%arg0: i32, %arg1: i32) -> (i32, i32) {
    %c0_i32 = arith.constant 0 : i32
    %c0_i32_0 = arith.constant 0 : i32
    return %arg0, %c0_i32 : i32, i32
  }
  func.func @transform_2(%arg0: i32, %arg1: i32) -> (i32, i32) {
    %c0_i32 = arith.constant 0 : i32
    %c0_i32_0 = arith.constant 0 : i32
    return %arg0, %c0_i32 : i32, i32
  }
  func.func @transform_3(%arg0: i32, %arg1: i32) -> (i32, i32) {
    %c0_i32 = arith.constant 0 : i32
    return %arg0, %arg1 : i32, i32
  }
}

</mosaic_0001>

<bundles_post_ra>
// kernel: tile.13
= control target key start
LH: loop header
LB: loop body
LE: loop exit
PB: predicated region body
PF: predicated region fallthrough
CT: control target
= control target key end

     0   :  { %s22_s0 = inlined_call_operand.vmem [shape: f32[8], index: 0, kind: input, shape index: {}]   ;;  %s23_s1 = inlined_call_operand.vmem [shape: f32[2,8], index: 1, kind: output, shape index: {}]  }
   0x1   :  { %v4_v0 = vld [vmem:[%s22_s0] ss:$0 sm:$0xff] }
   0x2   :  { %5 = vst [vmem:[%s23_s1] sm:$0x3] %v4_v0 }

// kernel: tile.0
= control target key start
LH: loop header
LB: loop body
LE: loop exit
PB: predicated region body
PF: predicated region fallthrough
CT: control target
= control target key end

     0   :  { %s66_s8 = smov 125   ;;  %vm7_vm0 = vcmask 7168   ;;  %s67_s11 = smov 126   ;;  %s117_s0 = inlined_call_operand.vmem [shape: f32[2,8], index: 0, kind: input, shape index: {}]   ;;  %s118_s1 = inlined_call_operand.vmem [shape: f32[16,1], index: 1, kind: output, shape index: {}]  }
   0x1   :  { %v4_v0 = vld [vmem:[%s117_s0] sm:$0x3]  ;;  %s65_s0 = smov 127   ;;  %s68_s12 = smov 124  }
   0x2   :  { %5 = vst [vmem:[#allocation0] sm:$0x3] %v4_v0  ;;  %s69_s13 = smov 123   ;;  %s70_s14 = smov 122  }
   0x3   :  { %s71_s15 = smov 121  }
   0x9   :  { %v9_v1 = vld [vmem:[#allocation0] sm:$0x3]  }
   0xa   :  { %v21_v2 = vld [vmem:[#allocation0] sm:$0x3]   ;;  %10 = vrot.lane.b32.xlu0 %v9_v1, %s65_s0 }
   0xb   :  { %22 = vrot.lane.b32.xlu1 %v21_v2, %s66_s8  ;;  %v15_v3 = vld [vmem:[#allocation0] sm:$0x3]  }
   0xc   :  { %v27_v4 = vld [vmem:[#allocation0] sm:$0x3]  }
   0xd   :  { %v6_v5 = vld [vmem:[#allocation0] sm:$0x3]  }
   0xe   :  { %8 = vst.msk [vmem:[%s118_s1] ss:$8 sm:$0x3] %vm7_vm0, %v6_v5   ;;  %16 = vrot.lane.b32.xlu0 %v15_v3, %s67_s11  ;;  %v33_v6 = vld [vmem:[#allocation0] sm:$0x3]  }
   0xf   :  { %28 = vrot.lane.b32.xlu1 %v27_v4, %s68_s12  ;;  %v39_v7 = vld [vmem:[#allocation0] sm:$0x3]  }
  0x10   :  { %v45_v8 = vld [vmem:[#allocation0] sm:$0x3]  }
  0x12   :  { %34 = vrot.lane.b32.xlu0 %v33_v6, %s69_s13 }
  0x13   :  { %40 = vrot.lane.b32.xlu1 %v39_v7, %s70_s14 }
  0x16   :  { %46 = vrot.lane.b32.xlu0 %v45_v8, %s71_s15 }
  0x7c   :  { %v11_v9 = vpop.permute.xlu0 %10  }
  0x7d   :  { %v23_v10 = vpop.permute.xlu1 %22   ;;  %51 = vst.msk [vmem:[%s118_s1 + $0x1] ss:$8 sm:$0x3] %vm7_vm0, %v11_v9  }
  0x7e   :  { %53 = vst.msk [vmem:[%s118_s1 + $0x3] ss:$8 sm:$0x3] %vm7_vm0, %v23_v10  }
  0x80   :  { %v17_v11 = vpop.permute.xlu0 %16  }
  0x81   :  { %v29_v12 = vpop.permute.xlu1 %28   ;;  %52 = vst.msk [vmem:[%s118_s1 + $0x2] ss:$8 sm:$0x3] %vm7_vm0, %v17_v11  }
  0x82   :  { %54 = vst.msk [vmem:[%s118_s1 + $0x4] ss:$8 sm:$0x3] %vm7_vm0, %v29_v12  }
  0x84   :  { %v35_v13 = vpop.permute.xlu0 %34  }
  0x85   :  { %v41_v14 = vpop.permute.xlu1 %40   ;;  %55 = vst.msk [vmem:[%s118_s1 + $0x5] ss:$8 sm:$0x3] %vm7_vm0, %v35_v13  }
  0x86   :  { %56 = vst.msk [vmem:[%s118_s1 + $0x6] ss:$8 sm:$0x3] %vm7_vm0, %v41_v14  }
  0x88   :  { %v47_v15 = vpop.permute.xlu0 %46  }
  0x89   :  { %57 = vst.msk [vmem:[%s118_s1 + $0x7] ss:$8 sm:$0x3] %vm7_vm0, %v47_v15  }

// kernel: conv_layer_forward.3
= control target key start
LH: loop header
LB: loop body
LE: loop exit
PB: predicated region body
PF: predicated region fallthrough
CT: control target
= control target key end

     0   :  { %v67_v0 = vmov 0   ;;  %s118_s2 = inlined_call_operand.vmem [shape: f32[16,1], index: 2, kind: input, shape index: {}]   ;;  %s119_s1 = inlined_call_operand.vmem [shape: f32[16,1], index: 1, kind: input, shape index: {}]   ;;  %s120_s0 = inlined_call_operand.vmem [shape: bf16[16,256], index: 0, kind: input, shape index: {}]   ;;  %s121_s3 = inlined_call_operand.vmem [shape: f32[16,256], index: 3, kind: output, shape index: {}]  }
   0x1   :  { %66 = vset.pattern.permute.xlu1 %v67_v0  ;;  %65 = vset.pattern.permute.xlu0 %v67_v0  ;;  %v36_v1 = vld [vmem:[%s118_s2] sm:$0xff]  ;;  %v37_v3 = vld [vmem:[%s118_s2 + $0x8] sm:$0xff] }
   0x2   :  { %v20_v2 = vld [vmem:[%s119_s1] sm:$0xff]  ;;  %40 = vperm.xlu1 %66, %v36_v1   ;;  %v21_v4 = vld [vmem:[%s119_s1 + $0x8] sm:$0xff] }
   0x3   :  { %24 = vperm.xlu0 %65, %v20_v2   ;;  %v14_v5 = vld [vmem:[%s120_s0] sm:$0xff]  ;;  %v15_v8 = vld [vmem:[%s120_s0 + $0x8] sm:$0xff] }
   0x4   :  { %v16_v6 = vunpack.c.l.bf16 %v14_v5  ;;  %v17_v7 = vunpack.c.h.bf16 %v14_v5  ;;  %v18_v13 = vunpack.c.l.bf16 %v15_v8  ;;  %v19_v14 = vunpack.c.h.bf16 %v15_v8 }
   0x6   :  { %45 = vperm.xlu1 %66, %v37_v3  }
   0x7   :  { %29 = vperm.xlu0 %65, %v21_v4  }
  0x81   :  { %v41_v9 = vpop.permute.xlu1 %40 }
  0x82   :  { %v25_v10 = vpop.permute.xlu0 %24 }
  0x83   :  { %v32_v11 = vmul.f32 %v25_v10, %v16_v6  ;;  %v33_v12 = vmul.f32 %v25_v10, %v17_v7 }
  0x85   :  { %v48_v15 = vadd.f32 %v41_v9, %v32_v11  ;;  %v49_v16 = vadd.f32 %v41_v9, %v33_v12  ;;  %v46_v22 = vpop.permute.xlu1 %45 }
  0x86   :  { %v30_v17 = vpop.permute.xlu0 %29 }
  0x87   :  { %v52_v18 = vmax.f32 %v48_v15, 0.0  ;;  %v53_v19 = vmax.f32 %v49_v16, 0.0  ;;  %v34_v20 = vmul.f32 %v30_v17, %v18_v13  ;;  %v35_v21 = vmul.f32 %v30_v17, %v19_v14 }
  0x89   :  { %56 = vst [vmem:[%s121_s3] sm:$0xff] %v52_v18  ;;  %57 = vst [vmem:[%s121_s3 + $0x8] sm:$0xff] %v53_v19  ;;  %v50_v23 = vadd.f32 %v46_v22, %v34_v20  ;;  %v51_v24 = vadd.f32 %v46_v22, %v35_v21 }
  0x8b   :  { %v54_v25 = vmax.f32 %v50_v23, 0.0  ;;  %v55_v26 = vmax.f32 %v51_v24, 0.0 }
  0x8d   :  { %58 = vst [vmem:[%s121_s3 + $0x10] sm:$0xff] %v54_v25  ;;  %59 = vst [vmem:[%s121_s3 + $0x18] sm:$0xff] %v55_v26 }

// kernel: conv_layer_forward.2
= control target key start
LH: loop header
LB: loop body
LE: loop exit
PB: predicated region body
PF: predicated region fallthrough
CT: control target
= control target key end

     0   :  { %s1958_s12 = smov 0   ;;  %s1960_s13 = smov 0   ;;  %s2332_s0 = inlined_call_operand.vmem [shape: bf16[2,1,288,128], index: 0, kind: input, shape index: {}]   ;;  %s2333_s1 = inlined_call_operand.vmem [shape: bf16[3,128,128], index: 1, kind: input, shape index: {}]   ;;  %s2334_s2 = inlined_call_operand.vmem [shape: bf16[2,8,256], index: 2, kind: output, shape index: {0}]   ;;  %s2335_s3 = inlined_call_operand.vmem [shape: f32[2,1,2,128], index: 3, kind: output, shape index: {1}]  }
   0x1   :  { %s1962_s14 = smov 0  }
   0x2 LB: > { %s26_s15 = sadd.s32 1, %s1932_s13  ;;  %p1430_p0 = scmp.ge.s32.totalorder %s1936_s14, 1  ;;  %s1936_s14 = sphi %s1962_s14, %s14_s14   ;;  %s1932_s13 = sphi %s1960_s13, %s2337_s13   ;;  %s1928_s12 = sphi %s1958_s12, %s2336_s12  }
   0x3   : > { %p28_p1 = scmp.ge.s32.totalorder %s26_s15, 2  ;;  %p162_p2 = scmp.lt.s32.totalorder %s1936_s14, 3 }
   0x5   : > { %s2339_s15 = smov (%p28_p1, %s26_s15), 0  ;;  %p163_p3 = pnand %p1430_p0, %p162_p2 }
   0x6   : > { %v1872_v0 = vld [vmem:[%s2333_s1 + $0x40] sm:$0xff] (!%p163_p3)   ;;  %p201_p4 = scmp.lt.s32.totalorder (!%p163_p3), %s1928_s12, 1  ;;  %v1874_v2 = vld [vmem:[%s2333_s1 + $0x48] sm:$0xff] (!%p163_p3)   ;;  %v1876_v4 = vld [vmem:[%s2333_s1 + $0x50] sm:$0xff] (!%p163_p3)  }
   0x7   : > { %166 = sbr.rel (%p163_p3) target bundleno = 455 (0x1c7), region = 28  ;;  %v1873_v1 = vld [vmem:[%s2333_s1] sm:$0xff] (!%p163_p3)   ;;  %1586 = vmatprep.subr.bf16.mxu1 (!%p163_p3), %v1872_v0  ;;  %v1988_v3 = vld [vmem:[%s2333_s1 + $0x8] sm:$0xff] (!%p163_p3)   ;;  %v1997_v5 = vld [vmem:[%s2333_s1 + $0x10] sm:$0xff] (!%p163_p3)  }
   0x8   : > { %1634 = vmatprep.subr.bf16.mxu0 (!%p163_p3), %v1873_v1  ;;  %1587 = vmatpush3.bf16.msra.mxu1 (!%p163_p3), %v1872_v0  ;;  %v1878_v6 = vld [vmem:[%s2333_s1 + $0x58] sm:$0xff] (!%p163_p3)   ;;  %v1880_v8 = vld [vmem:[%s2333_s1 + $0x60] sm:$0xff] (!%p163_p3)   ;;  %v1882_v10 = vld [vmem:[%s2333_s1 + $0x68] sm:$0xff] (!%p163_p3)  }
   0x9   : > { %1635 = vmatpush3.bf16.msra.mxu0 (!%p163_p3), %v1873_v1  ;;  %1588 = vmatprep.subr.bf16.mxu1 (!%p163_p3), %v1874_v2  ;;  %v2009_v7 = vld [vmem:[%s2333_s1 + $0x18] sm:$0xff] (!%p163_p3)   ;;  %v2020_v9 = vld [vmem:[%s2333_s1 + $0x20] sm:$0xff] (!%p163_p3)   ;;  %v2033_v11 = vld [vmem:[%s2333_s1 + $0x28] sm:$0xff] (!%p163_p3)  }
   0xa   : > { %1636 = vmatprep.subr.bf16.mxu0 (!%p163_p3), %v1988_v3  ;;  %v1884_v14 = vld [vmem:[%s2333_s1 + $0x70] sm:$0xff] (!%p163_p3)   ;;  %v1886_v16 = vld [vmem:[%s2333_s1 + $0x78] sm:$0xff] (!%p163_p3)   ;;  %v1891_v18 = vld [vmem:[%s2333_s1 + $0x80] sm:$0xff] (!%p163_p3)  }
   0xb   : > { %v2047_v15 = vld [vmem:[%s2333_s1 + $0x30] sm:$0xff] (!%p163_p3)   ;;  %v2057_v17 = vld [vmem:[%s2333_s1 + $0x38] sm:$0xff] (!%p163_p3)   ;;  %v1892_v21 = vld [vmem:[%s2333_s1 + $0x88] sm:$0xff] (!%p163_p3)  }
   0xc   : > { %1589 = vmatpush3.bf16.msra.mxu1 (!%p163_p3), %v1874_v2  ;;  %v1895_v22 = vld [vmem:[%s2333_s1 + $0x90] sm:$0xff] (!%p163_p3)   ;;  %v1896_v25 = vld [vmem:[%s2333_s1 + $0x98] sm:$0xff] (!%p163_p3)   ;;  %v1899_v26 = vld [vmem:[%s2333_s1 + $0xa0] sm:$0xff] (!%p163_p3)  }
   0xd   : > { %1637 = vmatpush3.bf16.msra.mxu0 (!%p163_p3), %v1988_v3  ;;  %1590 = vmatprep.subr.bf16.mxu1 (!%p163_p3), %v1876_v4  ;;  %v1900_v29 = vld [vmem:[%s2333_s1 + $0xa8] sm:$0xff] (!%p163_p3)   ;;  %v1903_v30 = vld [vmem:[%s2333_s1 + $0xb0] sm:$0xff] (!%p163_p3)   ;;  %v1904_v33 = vld [vmem:[%s2333_s1 + $0xb8] sm:$0xff] (!%p163_p3)  }
   0xe   : > { %s2341_s12 = smov (!%p201_p4, %s1928_s12), 1  ;;  %1638 = vmatprep.subr.bf16.mxu0 %v1997_v5 }
   0xf   : > { %s1810_s5 = smul.u32 144, %s2341_s12  ;;  %s1512_s26 = sshll.u32 %s2341_s12, 3 }
  0x10   : > { %1591 = vmatpush3.bf16.msra.mxu1 %v1876_v4  ;;  %s218_s29 = scalar_lea.vmem %s2334_s2, %s1512_s26 }
  0x11   : > { %1639 = vmatpush3.bf16.msra.mxu0 %v1997_v5  ;;  %1592 = vmatprep.subr.bf16.mxu1 %v1878_v6  ;;  %s2025_s16 = scalar_lea.vmem %s2332_s0, %s1810_s5 }
  0x12   : > { %1640 = vmatprep.subr.bf16.mxu0 %v2009_v7  ;;  %v1888_v12 = vld [vmem:[%s2025_s16 + $0x8] sm:$0xff]   ;;  %v1889_v13 = vld [vmem:[%s2025_s16] sm:$0xff]   ;;  %v1890_v19 = vld [vmem:[%s2025_s16 + $0x10] sm:$0xff]  }
  0x13   : > { %1602 = vmatprep.mubr.bf16.mxu1 %v1888_v12  ;;  %1650 = vmatprep.mubr.bf16.mxu0 %v1889_v13  ;;  %v2067_v20 = vld [vmem:[%s2025_s16 + $0x18] sm:$0xff]   ;;  %v1894_v23 = vld [vmem:[%s2025_s16 + $0x20] sm:$0xff]   ;;  %v1897_v24 = vld [vmem:[%s2025_s16 + $0x28] sm:$0xff]  }
  0x14   : > { %1593 = vmatpush3.bf16.msra.mxu1 %v1878_v6  ;;  %v1898_v27 = vld [vmem:[%s2025_s16 + $0x30] sm:$0xff]   ;;  %v1901_v28 = vld [vmem:[%s2025_s16 + $0x38] sm:$0xff]   ;;  %v1902_v31 = vld [vmem:[%s2025_s16 + $0x40] sm:$0xff]  }
  0x15   : > { %1641 = vmatpush3.bf16.msra.mxu0 %v2009_v7  ;;  %1594 = vmatprep.subr.bf16.mxu1 %v1880_v8  ;;  %v1905_v32 = vld [vmem:[%s2025_s16 + $0x48] sm:$0xff]   ;;  %v1906_v34 = vld [vmem:[%s2025_s16 + $0x50] sm:$0xff]   ;;  %v1907_v35 = vld [vmem:[%s2025_s16 + $0x58] sm:$0xff]  }
  0x16   : > { %1642 = vmatprep.subr.bf16.mxu0 %v2020_v9  ;;  %v1908_v36 = vld [vmem:[%s2025_s16 + $0x60] sm:$0xff]   ;;  %v1909_v37 = vld [vmem:[%s2025_s16 + $0x68] sm:$0xff]   ;;  %v1910_v38 = vld [vmem:[%s2025_s16 + $0x70] sm:$0xff]  }
  0x17   : > { %v1911_v39 = vld [vmem:[%s2025_s16 + $0x78] sm:$0xff]   ;;  %v1912_v40 = vld [vmem:[%s2025_s16 + $0x80] sm:$0xff]   ;;  %v1913_v41 = vld [vmem:[%s2025_s16 + $0x88] sm:$0xff]   ;;  %s1434_s16 = sshll.u32 %s2341_s12, 1 }
  0x18   : > { %1595 = vmatpush3.bf16.msra.mxu1 %v1880_v8  ;;  %s2245_s25 = scalar_lea.vmem %s2335_s3, %s1434_s16 }
  0x19   : > { %1643 = vmatpush3.bf16.msra.mxu0 %v2020_v9  ;;  %1596 = vmatprep.subr.bf16.mxu1 %v1882_v10 }
  0x1a   : > { %1644 = vmatprep.subr.bf16.mxu0 %v2033_v11 }
  0x1c   : > { %1597 = vmatpush3.bf16.msra.mxu1 %v1882_v10 }
  0x1d   : > { %1645 = vmatpush3.bf16.msra.mxu0 %v2033_v11  ;;  %1598 = vmatprep.subr.bf16.mxu1 %v1884_v14 }
  0x1e   : > { %1646 = vmatprep.subr.bf16.mxu0 %v2047_v15 }
  0x20   : > { %1599 = vmatpush3.bf16.msra.mxu1 %v1884_v14 }
  0x21   : > { %1647 = vmatpush3.bf16.msra.mxu0 %v2047_v15  ;;  %1600 = vmatprep.subr.bf16.mxu1 %v1886_v16 }
  0x22   : > { %1648 = vmatprep.subr.bf16.mxu0 %v2057_v17 }
  0x24   : > { %1601 = vmatpush3.bf16.msra.mxu1 %v1886_v16 }
  0x25   : > { %1649 = vmatpush3.bf16.msra.mxu0 %v2057_v17  ;;  %1730 = vmatprep.subr.bf16.mxu1 %v1873_v1 }
  0x26   : > { %1682 = vmatprep.subr.bf16.mxu0 %v1891_v18 }
  0x27   : > { %1603 = vmatmul.mubr.bf16.vlgmr.msra.gmra.mrb[0].mxu1 %v1890_v19 }
  0x28   : > { %1651 = vmatmul.mubr.bf16.vlgmr.msra.gmra.mrb[0].mxu0 %v1888_v12  ;;  %1738 = vmatpush3.bf16.msra.mxu1 %v1873_v1 }
  0x29   : > { %1683 = vmatpush3.bf16.msra.mxu0 %v1891_v18  ;;  %1606 = vmatprep.mubr.bf16.mxu1 %v2067_v20 }
  0x2a   : > { %1684 = vmatprep.subr.bf16.mxu0 %v1892_v21  ;;  %1654 = vmatprep.mubr.bf16.mxu0 %v1890_v19 }
  0x2b   : > { %1731 = vmatprep.subr.bf16.mxu1 %v1988_v3 }
  0x2c   : > { %1739 = vmatpush3.bf16.msra.mxu1 %v1988_v3 }
  0x2d   : > { %1685 = vmatpush3.bf16.msra.mxu0 %v1892_v21  ;;  %1732 = vmatprep.subr.bf16.mxu1 %v1997_v5 }
  0x2e   : > { %1686 = vmatprep.subr.bf16.mxu0 %v1895_v22 }
  0x2f   : > { %1607 = vmatmul.mubr.bf16.gmra.mrb[4].mxu1 %v1894_v23 }
  0x30   : > { %1655 = vmatmul.mubr.bf16.gmra.mrb[4].mxu0 %v2067_v20  ;;  %1610 = vmatprep.mubr.bf16.mxu1 %v1897_v24 }
  0x31   : > { %1687 = vmatpush3.bf16.msra.mxu0 %v1895_v22  ;;  %1658 = vmatprep.mubr.bf16.mxu0 %v1894_v23 }
  0x32   : > { %1688 = vmatprep.subr.bf16.mxu0 %v1896_v25  ;;  %1740 = vmatpush3.bf16.msra.mxu1 %v1997_v5 }
  0x33   : > { %1733 = vmatprep.subr.bf16.mxu1 %v2009_v7 }
  0x35   : > { %1689 = vmatpush3.bf16.msra.mxu0 %v1896_v25 }
  0x36   : > { %1690 = vmatprep.subr.bf16.mxu0 %v1899_v26  ;;  %1741 = vmatpush3.bf16.msra.mxu1 %v2009_v7 }
  0x37   : > { %1611 = vmatmul.mubr.bf16.gmra.mrb[8].mxu1 %v1898_v27  ;;  %1734 = vmatprep.subr.bf16.mxu1 %v2020_v9 }
  0x38   : > { %1659 = vmatmul.mubr.bf16.gmra.mrb[8].mxu0 %v1897_v24  ;;  %1614 = vmatprep.mubr.bf16.mxu1 %v1901_v28 }
  0x39   : > { %1691 = vmatpush3.bf16.msra.mxu0 %v1899_v26  ;;  %1662 = vmatprep.mubr.bf16.mxu0 %v1898_v27 }
  0x3a   : > { %1692 = vmatprep.subr.bf16.mxu0 %v1900_v29  ;;  %1742 = vmatpush3.bf16.msra.mxu1 %v2020_v9 }
  0x3b   : > { %1735 = vmatprep.subr.bf16.mxu1 %v2033_v11 }
  0x3d   : > { %1693 = vmatpush3.bf16.msra.mxu0 %v1900_v29 }
  0x3e   : > { %1694 = vmatprep.subr.bf16.mxu0 %v1903_v30  ;;  %1743 = vmatpush3.bf16.msra.mxu1 %v2033_v11 }
  0x3f   : > { %1615 = vmatmul.mubr.bf16.gmra.mrb[12].mxu1 %v1902_v31  ;;  %1736 = vmatprep.subr.bf16.mxu1 %v2047_v15 }
  0x40   : > { %1663 = vmatmul.mubr.bf16.gmra.mrb[12].mxu0 %v1901_v28  ;;  %1618 = vmatprep.mubr.bf16.mxu1 %v1905_v32 }
  0x41   : > { %1695 = vmatpush3.bf16.msra.mxu0 %v1903_v30  ;;  %1698 = vmatprep.mubr.bf16.mxu0 %v1890_v19 }
  0x42   : > { %1696 = vmatprep.subr.bf16.mxu0 %v1904_v33  ;;  %1744 = vmatpush3.bf16.msra.mxu1 %v2047_v15 }
  0x43   : > { %1737 = vmatprep.subr.bf16.mxu1 %v2057_v17 }
  0x45   : > { %1697 = vmatpush3.bf16.msra.mxu0 %v1904_v33 }
  0x46   : > { %1745 = vmatpush3.bf16.msra.mxu1 %v2057_v17 }
  0x47   : > { %1619 = vmatmul.mubr.bf16.gmra.mrb[16].mxu1 %v1906_v34 }
  0x48   : > { %1699 = vmatmul.mubr.bf16.vlgmr.msra.gmra.mrb[0].mxu0 %v2067_v20  ;;  %1622 = vmatprep.mubr.bf16.mxu1 %v1907_v35 }
  0x49   : > { %1702 = vmatprep.mubr.bf16.mxu0 %v1894_v23 }
  0x4f   : > { %1623 = vmatmul.mubr.bf16.gmra.mrb[20].mxu1 %v1908_v36 }
  0x50   : > { %1703 = vmatmul.mubr.bf16.gmra.mrb[4].mxu0 %v1897_v24  ;;  %1626 = vmatprep.mubr.bf16.mxu1 %v1909_v37 }
  0x51   : > { %1706 = vmatprep.mubr.bf16.mxu0 %v1898_v27 }
  0x57   : > { %1627 = vmatmul.mubr.bf16.gmra.mrb[24].mxu1 %v1910_v38 }
  0x58   : > { %1707 = vmatmul.mubr.bf16.gmra.mrb[8].mxu0 %v1901_v28  ;;  %1630 = vmatprep.mubr.bf16.mxu1 %v1911_v39 }
  0x59   : > { %1710 = vmatprep.mubr.bf16.mxu0 %v1902_v31 }
  0x5f   : > { %1631 = vmatmul.mubr.bf16.gmra.mrb[28].mxu1 %v1912_v40 }
  0x60   : > { %1711 = vmatmul.mubr.bf16.gmra.mrb[12].mxu0 %v1905_v32  ;;  %1666 = vmatprep.mubr.bf16.mxu1 %v1902_v31 }
  0x61   : > { %1714 = vmatprep.mubr.bf16.mxu0 %v1906_v34 }
  0x67   : > { %1667 = vmatmul.mubr.bf16.vlgmr.msra.gmra.mrb[16].mxu1 %v1905_v32 }
  0x68   : > { %1715 = vmatmul.mubr.bf16.gmra.mrb[16].mxu0 %v1907_v35  ;;  %1670 = vmatprep.mubr.bf16.mxu1 %v1906_v34 }
  0x69   : > { %1718 = vmatprep.mubr.bf16.mxu0 %v1908_v36 }
  0x6f   : > { %1671 = vmatmul.mubr.bf16.gmra.mrb[20].mxu1 %v1907_v35 }
  0x70   : > { %1719 = vmatmul.mubr.bf16.gmra.mrb[20].mxu0 %v1909_v37  ;;  %1674 = vmatprep.mubr.bf16.mxu1 %v1908_v36 }
  0x71   : > { %1722 = vmatprep.mubr.bf16.mxu0 %v1910_v38 }
  0x77   : > { %1675 = vmatmul.mubr.bf16.gmra.mrb[24].mxu1 %v1909_v37 }
  0x78   : > { %1723 = vmatmul.mubr.bf16.gmra.mrb[24].mxu0 %v1911_v39  ;;  %1678 = vmatprep.mubr.bf16.mxu1 %v1910_v38 }
  0x79   : > { %1726 = vmatprep.mubr.bf16.mxu0 %v1912_v40 }
  0x7f   : > { %1679 = vmatmul.mubr.bf16.gmra.mrb[28].mxu1 %v1911_v39 }
  0x80   : > { %1727 = vmatmul.mubr.bf16.gmra.mrb[28].mxu0 %v1913_v41 }
  0xfa   : > { %v1604_v42 = vpop.f32.mrb[0].mxu1 }
  0xfb   : > { %v475_v43 = vpop.f32.mrb[1].mxu1 }
  0xfc   : > { %v1605_v44 = vpop.f32.mrb[2].mxu1 }
  0xfd   : > { %v478_v45 = vpop.f32.mrb[3].mxu1 }
 0x102   : > { %v1608_v46 = vpop.f32.mrb[4].mxu1 }
 0x103   : > { %v491_v47 = vpop.f32.mrb[5].mxu1 }
 0x104   : > { %v1609_v48 = vpop.f32.mrb[6].mxu1 }
 0x105   : > { %v494_v49 = vpop.f32.mrb[7].mxu1 }
 0x10a   : > { %v1612_v50 = vpop.f32.mrb[8].mxu1 }
 0x10b   : > { %v507_v51 = vpop.f32.mrb[9].mxu1 }
 0x10c   : > { %v1613_v52 = vpop.f32.mrb[10].mxu1 }
 0x10d   : > { %v510_v53 = vpop.f32.mrb[11].mxu1 }
 0x112   : > { %v1616_v54 = vpop.f32.mrb[12].mxu1 }
 0x113   : > { %v523_v55 = vpop.f32.mrb[13].mxu1 }
 0x114   : > { %v1617_v56 = vpop.f32.mrb[14].mxu1 }
 0x115   : > { %v526_v57 = vpop.f32.mrb[15].mxu1 }
 0x11b   : > { %v1700_v58 = vpop.f32.mrb[0].mxu0 }
 0x11c   : > { %v2121_v59 = vadd.f32 %v1700_v58, %v1604_v42  ;;  %v922_v60 = vpop.f32.mrb[1].mxu0 }
 0x11d   : > { %v2123_v61 = vadd.f32 %v922_v60, %v475_v43  ;;  %v1701_v62 = vpop.f32.mrb[2].mxu0 }
 0x11e   : > { %v2125_v63 = vadd.f32 %v1701_v62, %v1605_v44  ;;  %v925_v0 = vpop.f32.mrb[3].mxu0 }
 0x11f   : > { %v2127_v1 = vadd.f32 %v925_v0, %v478_v45 }
 0x121   : > { %v1081_v2 = vadd.f32 %v2127_v1, %v2123_v61 }
 0x123   : > { %v1082_v3 = vadd.f32 %v2121_v59, %v1081_v2  ;;  %v1704_v4 = vpop.f32.mrb[4].mxu0 }
 0x124   : > { %v2132_v5 = vadd.f32 %v1704_v4, %v1608_v46  ;;  %v938_v6 = vpop.f32.mrb[5].mxu0 }
 0x125   : > { %v2134_v7 = vadd.f32 %v938_v6, %v491_v47  ;;  %v1083_v8 = vadd.f32 %v2125_v63, %v1082_v3  ;;  %v1705_v9 = vpop.f32.mrb[6].mxu0 }
 0x126   : > { %v2137_v10 = vadd.f32 %v1705_v9, %v1609_v48  ;;  %v941_v11 = vpop.f32.mrb[7].mxu0 }
 0x127   : > { %v1084_v12 = vadd.f32 %v2134_v7, %v1083_v8  ;;  %v2140_v13 = vadd.f32 %v941_v11, %v494_v49 }
 0x129   : > { %v1085_v14 = vadd.f32 %v2140_v13, %v1084_v12 }
 0x12b   : > { %v1086_v15 = vadd.f32 %v2132_v5, %v1085_v14  ;;  %v1708_v16 = vpop.f32.mrb[8].mxu0 }
 0x12c   : > { %v2144_v17 = vadd.f32 %v1708_v16, %v1612_v50  ;;  %v954_v18 = vpop.f32.mrb[9].mxu0 }
 0x12d   : > { %v2146_v19 = vadd.f32 %v954_v18, %v507_v51  ;;  %v1087_v20 = vadd.f32 %v2137_v10, %v1086_v15  ;;  %v1709_v21 = vpop.f32.mrb[10].mxu0 }
 0x12e   : > { %v2149_v22 = vadd.f32 %v1709_v21, %v1613_v52  ;;  %v957_v23 = vpop.f32.mrb[11].mxu0 }
 0x12f   : > { %v1088_v24 = vadd.f32 %v2146_v19, %v1087_v20  ;;  %v2152_v25 = vadd.f32 %v957_v23, %v510_v53 }
 0x131   : > { %v1089_v26 = vadd.f32 %v2152_v25, %v1088_v24 }
 0x133   : > { %v1090_v27 = vadd.f32 %v2144_v17, %v1089_v26  ;;  %v1712_v28 = vpop.f32.mrb[12].mxu0 }
 0x134   : > { %v2156_v29 = vadd.f32 %v1712_v28, %v1616_v54  ;;  %v970_v30 = vpop.f32.mrb[13].mxu0 }
 0x135   : > { %v2158_v31 = vadd.f32 %v970_v30, %v523_v55  ;;  %v1091_v32 = vadd.f32 %v2149_v22, %v1090_v27  ;;  %v1713_v33 = vpop.f32.mrb[14].mxu0 }
 0x136   : > { %v2161_v34 = vadd.f32 %v1713_v33, %v1617_v56  ;;  %v973_v35 = vpop.f32.mrb[15].mxu0 }
 0x137   : > { %v1092_v36 = vadd.f32 %v2158_v31, %v1091_v32  ;;  %v2164_v37 = vadd.f32 %v973_v35, %v526_v57 }
 0x139   : > { %v1093_v38 = vadd.f32 %v2164_v37, %v1092_v36 }
 0x13a   : > { %v1668_v39 = vpop.f32.mrb[16].mxu1 }
 0x13b   : > { %v1094_v40 = vadd.f32 %v2156_v29, %v1093_v38  ;;  %v1716_v41 = vpop.f32.mrb[16].mxu0  ;;  %v754_v42 = vpop.f32.mrb[17].mxu1 }
 0x13c   : > { %v2168_v43 = vadd.f32 %v1716_v41, %v1668_v39  ;;  %v986_v44 = vpop.f32.mrb[17].mxu0  ;;  %v1669_v45 = vpop.f32.mrb[18].mxu1 }
 0x13d   : > { %v2170_v46 = vadd.f32 %v986_v44, %v754_v42  ;;  %v1095_v47 = vadd.f32 %v2161_v34, %v1094_v40  ;;  %v1717_v48 = vpop.f32.mrb[18].mxu0  ;;  %v757_v49 = vpop.f32.mrb[19].mxu1 }
 0x13e   : > { %v2173_v50 = vadd.f32 %v1717_v48, %v1669_v45  ;;  %v989_v51 = vpop.f32.mrb[19].mxu0  ;;  %v1839_v16 = vpack.i.bf16 %v2168_v43, %v2121_v59 }
 0x13f   : > { %v1096_v52 = vadd.f32 %v2170_v46, %v1095_v47  ;;  %v2176_v53 = vadd.f32 %v989_v51, %v757_v49  ;;  %v1835_v54 = vpack.i.bf16 %v2170_v46, %v2123_v61 }
 0x140   : > { %v1841_v26 = vpack.i.bf16 %v2173_v50, %v2125_v63 }
 0x141   : > { %v1097_v55 = vadd.f32 %v2176_v53, %v1096_v52  ;;  %1836 = vxpose.xlu0.b32.start [1/16] (narrow) %v1835_v54, 8  ;;  %v1837_v62 = vpack.i.bf16 %v2176_v53, %v2127_v1 }
 0x142   : > { %v1672_v56 = vpop.f32.mrb[20].mxu1 }
 0x143   : > { %v1098_v57 = vadd.f32 %v2168_v43, %v1097_v55  ;;  %v1720_v58 = vpop.f32.mrb[20].mxu0  ;;  %v770_v60 = vpop.f32.mrb[21].mxu1 }
 0x144   : > { %v2184_v0 = vadd.f32 %v1720_v58, %v1672_v56  ;;  %v1002_v2 = vpop.f32.mrb[21].mxu0  ;;  %v1673_v3 = vpop.f32.mrb[22].mxu1 }
 0x145   : > { %v2186_v4 = vadd.f32 %v1002_v2, %v770_v60  ;;  %v1099_v6 = vadd.f32 %v2173_v50, %v1098_v57  ;;  %1838 = vxpose.xlu0.b32.cont [2/16] (narrow) %v1837_v62, 8  ;;  %v1721_v8 = vpop.f32.mrb[22].mxu0  ;;  %v773_v9 = vpop.f32.mrb[23].mxu1 }
 0x146   : > { %v2189_v11 = vadd.f32 %v1721_v8, %v1673_v3  ;;  %v1005_v12 = vpop.f32.mrb[23].mxu0 }
 0x147   : > { %v1100_v14 = vadd.f32 %v2186_v4, %v1099_v6  ;;  %v2192_v15 = vadd.f32 %v1005_v12, %v773_v9  ;;  %v1843_v44 = vpack.i.bf16 %v2186_v4, %v2134_v7 }
 0x149   : > { %v1101_v18 = vadd.f32 %v2192_v15, %v1100_v14  ;;  %1840 = vxpose.xlu0.b32.cont [3/16] (narrow) %v1839_v16, 8  ;;  %v1845_v56 = vpack.i.bf16 %v2192_v15, %v2140_v13 }
 0x14a   : > { %v1676_v20 = vpop.f32.mrb[24].mxu1 }
 0x14b   : > { %v1102_v21 = vadd.f32 %v2184_v0, %v1101_v18  ;;  %v1724_v23 = vpop.f32.mrb[24].mxu0  ;;  %v786_v24 = vpop.f32.mrb[25].mxu1  ;;  %v1847_v18 = vpack.i.bf16 %v2184_v0, %v2132_v5 }
 0x14c   : > { %v2200_v27 = vadd.f32 %v1724_v23, %v1676_v20  ;;  %v1018_v28 = vpop.f32.mrb[25].mxu0  ;;  %v1677_v30 = vpop.f32.mrb[26].mxu1 }
 0x14d   : > { %v2202_v32 = vadd.f32 %v1018_v28, %v786_v24  ;;  %v1103_v33 = vadd.f32 %v2189_v11, %v1102_v21  ;;  %1842 = vxpose.xlu0.b32.cont [4/16] (narrow) %v1841_v26, 8  ;;  %v1725_v35 = vpop.f32.mrb[26].mxu0  ;;  %v789_v36 = vpop.f32.mrb[27].mxu1  ;;  %v1849_v28 = vpack.i.bf16 %v2189_v11, %v2137_v10 }
 0x14e   : > { %v2205_v38 = vadd.f32 %v1725_v35, %v1677_v30  ;;  %v1021_v39 = vpop.f32.mrb[27].mxu0  ;;  %v1855_v40 = vpack.i.bf16 %v2200_v27, %v2144_v17 }
 0x14f   : > { %v1104_v41 = vadd.f32 %v2202_v32, %v1103_v33  ;;  %v2210_v42 = vadd.f32 %v1021_v39, %v789_v36  ;;  %v1851_v45 = vpack.i.bf16 %v2202_v32, %v2146_v19 }
 0x150   : > { %v1857_v47 = vpack.i.bf16 %v2205_v38, %v2149_v22 }
 0x151   : > { %v1105_v48 = vadd.f32 %v2210_v42, %v1104_v41  ;;  %1844 = vxpose.xlu0.b32.cont [5/16] (narrow) %v1843_v44, 8  ;;  %v1853_v49 = vpack.i.bf16 %v2210_v42, %v2152_v25 }
 0x152   : > { %v1680_v51 = vpop.f32.mrb[28].mxu1 }
 0x153   : > { %v1106_v52 = vadd.f32 %v2200_v27, %v1105_v48  ;;  %v1728_v54 = vpop.f32.mrb[28].mxu0  ;;  %v802_v55 = vpop.f32.mrb[29].mxu1 }
 0x154   : > { %v2224_v57 = vadd.f32 %v1728_v54, %v1680_v51  ;;  %v1034_v58 = vpop.f32.mrb[29].mxu0  ;;  %v1681_v60 = vpop.f32.mrb[30].mxu1 }
 0x155   : > { %v1775_v62 = vadd.f32 %v1034_v58, %v802_v55  ;;  %v1107_v2 = vadd.f32 %v2205_v38, %v1106_v52  ;;  %1846 = vxpose.xlu0.b32.cont [6/16] (narrow) %v1845_v56, 8  ;;  %v1729_v3 = vpop.f32.mrb[30].mxu0  ;;  %v805_v6 = vpop.f32.mrb[31].mxu1 }
 0x156   : > { %v2227_v8 = vadd.f32 %v1729_v3, %v1681_v60  ;;  %v1037_v9 = vpop.f32.mrb[31].mxu0  ;;  %v1863_v12 = vpack.i.bf16 %v2224_v57, %v2156_v29 }
 0x157   : > { %v1108_v14 = vadd.f32 %v1775_v62, %v1107_v2  ;;  %v1777_v16 = vadd.f32 %v1037_v9, %v805_v6  ;;  %v1859_v20 = vpack.i.bf16 %v1775_v62, %v2158_v31 }
 0x158   : > { %v1865_v21 = vpack.i.bf16 %v2227_v8, %v2161_v34 }
 0x159   : > { %v1109_v23 = vadd.f32 %v1777_v16, %v1108_v14  ;;  %1848 = vxpose.xlu0.b32.cont [7/16] (narrow) %v1847_v18, 8  ;;  %v1861_v24 = vpack.i.bf16 %v1777_v16, %v2164_v37 }
 0x15b   : > { %v1110_v26 = vadd.f32 %v2224_v57, %v1109_v23 }
 0x15d   : > { %v1111_v30 = vadd.f32 %v2227_v8, %v1110_v26  ;;  %1850 = vxpose.xlu0.b32.cont [8/16] (narrow) %v1849_v28, 8 }
 0x15f   : > { %v1112_v33 = vrot.slane %v1111_v30, 4 }
 0x161   : > { %v1113_v35 = vadd.f32 %v1112_v33, %v1111_v30  ;;  %1852 = vxpose.xlu0.b32.cont [9/16] (narrow) %v1851_v45, 8 }
 0x163   : > { %v1114_v36 = vrot.slane %v1113_v35, 2 }
 0x165   : > { %v1115_v39 = vadd.f32 %v1114_v36, %v1113_v35  ;;  %1854 = vxpose.xlu0.b32.cont [10/16] (narrow) %v1853_v49, 8 }
 0x167   : > { %v1116_v41 = vrot.slane %v1115_v39, 1 }
 0x169   : > { %v1117_v44 = vadd.f32 %v1116_v41, %v1115_v39  ;;  %1856 = vxpose.xlu0.b32.cont [11/16] (narrow) %v1855_v40, 8 }
 0x16b   : > { %v1118_v48 = vmul.f32 0.00390625, %v1117_v44  ;;  %1220 = vst [vmem:[%s2245_s25] sm:$0x1] %v1117_v44 }
 0x16d   : > { %1858 = vxpose.xlu0.b32.cont [12/16] (narrow) %v1857_v47, 8  ;;  %v1127_v51 = vsub.f32 %v2146_v19, %v1118_v48  ;;  %v1128_v45 = vsub.f32 %v2152_v25, %v1118_v48  ;;  %v1129_v52 = vsub.f32 %v2144_v17, %v1118_v48  ;;  %v1130_v49 = vsub.f32 %v2149_v22, %v1118_v48 }
 0x16e   : > { %v1131_v54 = vsub.f32 %v2158_v31, %v1118_v48  ;;  %v1132_v55 = vsub.f32 %v2164_v37, %v1118_v48  ;;  %v1133_v56 = vsub.f32 %v2156_v29, %v1118_v48  ;;  %v1134_v58 = vsub.f32 %v2161_v34, %v1118_v48 }
 0x16f   : > { %v1135_v40 = vsub.f32 %v2170_v46, %v1118_v48  ;;  %v1136_v47 = vsub.f32 %v2176_v53, %v1118_v48  ;;  %v1137_v19 = vsub.f32 %v2168_v43, %v1118_v48  ;;  %v1138_v25 = vsub.f32 %v2173_v50, %v1118_v48 }
 0x170   : > { %v1139_v17 = vsub.f32 %v2186_v4, %v1118_v48  ;;  %v1140_v22 = vsub.f32 %v2192_v15, %v1118_v48  ;;  %v2263_v31 = vsub.f32 %v2184_v0, %v1118_v48  ;;  %v2266_v29 = vsub.f32 %v2189_v11, %v1118_v48 }
 0x171   : > { %1860 = vxpose.xlu0.b32.cont [13/16] (narrow) %v1859_v20, 8  ;;  %v2269_v34 = vsub.f32 %v2202_v32, %v1118_v48  ;;  %v2272_v37 = vsub.f32 %v2210_v42, %v1118_v48  ;;  %v2275_v43 = vsub.f32 %v2200_v27, %v1118_v48  ;;  %v2278_v46 = vsub.f32 %v2205_v38, %v1118_v48 }
 0x172   : > { %v2280_v50 = vsub.f32 %v1775_v62, %v1118_v48  ;;  %v2282_v53 = vsub.f32 %v1777_v16, %v1118_v48  ;;  %v2285_v0 = vsub.f32 %v2224_v57, %v1118_v48  ;;  %v2288_v4 = vsub.f32 %v2227_v8, %v1118_v48 }
 0x173   : > { %v1119_v11 = vsub.f32 %v2123_v61, %v1118_v48  ;;  %v1120_v15 = vsub.f32 %v2127_v1, %v1118_v48  ;;  %v1121_v27 = vsub.f32 %v2121_v59, %v1118_v48  ;;  %v1122_v42 = vsub.f32 %v2125_v63, %v1118_v48 }
 0x174   : > { %v1123_v60 = vsub.f32 %v2134_v7, %v1118_v48  ;;  %v1124_v2 = vsub.f32 %v2140_v13, %v1118_v48  ;;  %v1125_v61 = vsub.f32 %v2132_v5, %v1118_v48  ;;  %v1126_v59 = vsub.f32 %v2137_v10, %v1118_v48 }
 0x175   : > { %1862 = vxpose.xlu0.b32.cont [14/16] (narrow) %v1861_v24, 8  ;;  %v1151_v32 = vmul.f32 %v1119_v11, %v1119_v11  ;;  %v1152_v38 = vmul.f32 %v1120_v15, %v1120_v15  ;;  %v1153_v62 = vmul.f32 %v1121_v27, %v1121_v27  ;;  %v1154_v3 = vmul.f32 %v1122_v42, %v1122_v42 }
 0x176   : > { %v1155_v1 = vmul.f32 %v1123_v60, %v1123_v60  ;;  %v1156_v9 = vmul.f32 %v1124_v2, %v1124_v2  ;;  %v1158_v63 = vmul.f32 %v1126_v59, %v1126_v59  ;;  %v1159_v7 = vmul.f32 %v1127_v51, %v1127_v51 }
 0x177   : > { %v1183_v57 = vadd.f32 %v1152_v38, %v1151_v32  ;;  %v1160_v23 = vmul.f32 %v1128_v45, %v1128_v45  ;;  %v1161_v24 = vmul.f32 %v1129_v52, %v1129_v52  ;;  %v1162_v26 = vmul.f32 %v1130_v49, %v1130_v49 }
 0x178   : > { %v1163_v30 = vmul.f32 %v1131_v54, %v1131_v54  ;;  %v1164_v33 = vmul.f32 %v1132_v55, %v1132_v55  ;;  %v1165_v36 = vmul.f32 %v1133_v56, %v1133_v56  ;;  %v1166_v39 = vmul.f32 %v1134_v58, %v1134_v58 }
 0x179   : > { %1864 = vxpose.xlu0.b32.cont [15/16] (narrow) %v1863_v12, 8  ;;  %v1184_v6 = vadd.f32 %v1183_v57, %v1153_v62  ;;  %v1157_v12 = vmul.f32 %v1125_v61, %v1125_v61  ;;  %v1167_v44 = vmul.f32 %v1135_v40, %v1135_v40  ;;  %v1168_v11 = vmul.f32 %v1136_v47, %v1136_v47 }
 0x17a   : > { %v1169_v51 = vmul.f32 %v1137_v19, %v1137_v19  ;;  %v1170_v45 = vmul.f32 %v1138_v25, %v1138_v25  ;;  %v1171_v52 = vmul.f32 %v1139_v17, %v1139_v17  ;;  %v1172_v49 = vmul.f32 %v1140_v22, %v1140_v22 }
 0x17b   : > { %v1185_v8 = vadd.f32 %v1184_v6, %v1154_v3  ;;  %v1173_v54 = vmul.f32 %v2263_v31, %v2263_v31  ;;  %v1174_v56 = vmul.f32 %v2266_v29, %v2266_v29  ;;  %v1175_v40 = vmul.f32 %v2269_v34, %v2269_v34 }
 0x17c   : > { %v1176_v19 = vmul.f32 %v2272_v37, %v2272_v37  ;;  %v1177_v17 = vmul.f32 %v2275_v43, %v2275_v43  ;;  %v1178_v31 = vmul.f32 %v2278_v46, %v2278_v46  ;;  %v1179_v29 = vmul.f32 %v2280_v50, %v2280_v50 }
 0x17d   : > { %1866 = vxpose.xlu0.b32.end [16/16] (narrow) %v1865_v21, 8  ;;  %v1186_v14 = vadd.f32 %v1185_v8, %v1155_v1  ;;  %v1180_v34 = vmul.f32 %v2282_v53, %v2282_v53  ;;  %v1181_v37 = vmul.f32 %v2285_v0, %v2285_v0  ;;  %v1182_v43 = vmul.f32 %v2288_v4, %v2288_v4 }
 0x17f   : > { %v1187_v16 = vadd.f32 %v1186_v14, %v1156_v9 }
 0x181   : > { %v1188_v18 = vadd.f32 %v1187_v16, %v1157_v12 }
 0x183   : > { %v1189_v20 = vadd.f32 %v1188_v18, %v1158_v63 }
 0x185   : > { %v1190_v21 = vadd.f32 %v1189_v20, %v1159_v7 }
 0x187   : > { %v1191_v13 = vadd.f32 %v1190_v21, %v1160_v23 }
 0x189   : > { %v1192_v28 = vadd.f32 %v1191_v13, %v1161_v24 }
 0x18b   : > { %v1193_v5 = vadd.f32 %v1192_v28, %v1162_v26 }
 0x18d   : > { %v1194_v35 = vadd.f32 %v1193_v5, %v1163_v30 }
 0x18f   : > { %v1195_v10 = vadd.f32 %v1194_v35, %v1164_v33 }
 0x191   : > { %v1196_v41 = vadd.f32 %v1195_v10, %v1165_v36 }
 0x193   : > { %v1197_v48 = vadd.f32 %v1196_v41, %v1166_v39 }
 0x195   : > { %v1198_v15 = vadd.f32 %v1197_v48, %v1167_v44 }
 0x197   : > { %v1199_v27 = vadd.f32 %v1198_v15, %v1168_v11 }
 0x199   : > { %v1200_v32 = vadd.f32 %v1199_v27, %v1169_v51 }
 0x19b   : > { %v1201_v38 = vadd.f32 %v1200_v32, %v1170_v45 }
 0x19d   : > { %v1202_v42 = vadd.f32 %v1201_v38, %v1171_v52 }
 0x19f   : > { %v1203_v55 = vadd.f32 %v1202_v42, %v1172_v49 }
 0x1a1   : > { %v1204_v58 = vadd.f32 %v1203_v55, %v1173_v54 }
 0x1a3   : > { %v1205_v47 = vadd.f32 %v1204_v58, %v1174_v56 }
 0x1a5   : > { %v1206_v25 = vadd.f32 %v1205_v47, %v1175_v40 }
 0x1a7   : > { %v1207_v22 = vadd.f32 %v1206_v25, %v1176_v19 }
 0x1a9   : > { %v1208_v60 = vadd.f32 %v1207_v22, %v1177_v17 }
 0x1ab   : > { %v1209_v62 = vadd.f32 %v1208_v60, %v1178_v31 }
 0x1ad   : > { %v1210_v57 = vadd.f32 %v1209_v62, %v1179_v29 }
 0x1af   : > { %v1211_v2 = vadd.f32 %v1210_v57, %v1180_v34 }
 0x1b1   : > { %v1212_v3 = vadd.f32 %v1211_v2, %v1181_v37 }
 0x1b3   : > { %v1213_v6 = vadd.f32 %v1212_v3, %v1182_v43 }
 0x1b5   : > { %v1214_v46 = vrot.slane %v1213_v6, 4 }
 0x1b7   : > { %v1215_v61 = vadd.f32 %v1214_v46, %v1213_v6 }
 0x1b9   : > { %v1216_v1 = vrot.slane %v1215_v61, 2 }
 0x1bb   : > { %v1217_v50 = vadd.f32 %v1216_v1, %v1215_v61 }
 0x1bd   : > { %v1218_v53 = vrot.slane %v1217_v50, 1 }
 0x1bf   : > { %v1219_v14 = vadd.f32 %v1218_v53, %v1217_v50 }
 0x1c1   : > { %v1867_v8 = vpop.trf.xlu0  ;;  %1221 = vst [vmem:[%s2245_s25 + $0x1] sm:$0x1] %v1219_v14 }
 0x1c2   : > { %v1871_v59 = vunpack.i.h.bf16 %v1867_v8  ;;  %v1868_v9 = vunpack.i.l.bf16 %v1867_v8 }
 0x1c4   : > { %v1513_v0 = vpack.c.bf16 %v1871_v59, %v1868_v9 }
 0x1c6   : > { %1294 = vst [vmem:[%s218_s29] sm:$0xff] %v1513_v0 }
 0x1c7 PF: > { %s14_s14 = sadd.s32 1, %s1936_s14   ;;  %s2336_s12 = smov %s1932_s13 }
 0x1c8   : > { %p11_p5 = scmp.ge.s32.totalorder %s14_s14, 4   ;;  %s2337_s13 = smov %s2339_s15 }
 0x1ca   :  { %13 = sbr.rel (!%p11_p5) target bundleno = 2 (0x2), region = 72 }

</bundles_post_ra>
